<compile_context>
chip_gen: v7x
topology: tpu7x:2x2x1
jax: 0.10.0
libtpu: 0.0.40
codegen_flags: <defaults>
</compile_context>

<pallas_src>
import functools
import math

import jax
import jax.numpy as jnp
from jax.experimental import pallas as pl
from jax.experimental.pallas import tpu as pltpu

NUM_JOINTS = 17
KP_FEAT = NUM_JOINTS * 3   # 51
KP_PAD = 128               # lane-dense padded keypoint feature width


def pose_embed_kernel(gt_ref, pbT_ref, pk_ref, psT_ref, w_ref, b_ref,
                      emb_ref, kp_ref, *, img_w, img_h, threshold):
    # Per-image blocks (leading batch dim squeezed away by the BlockSpec).
    gt = gt_ref[...]        # [N, 4]        cxcywh normalized
    pbT = pbT_ref[...]      # [4, M]        xyxy absolute, lane-major
    pk = pk_ref[...]        # [M, KP_PAD]   keypoints (zero-padded 51->128)
    sc = psT_ref[...]       # [1, M]        scores, lane-major

    N = gt.shape[0]
    M = pbT.shape[1]

    # --- cxcywh (normalized) -> xyxy (absolute pixels) ----------------------
    gcx = gt[:, 0:1]
    gcy = gt[:, 1:2]
    gw = gt[:, 2:3]
    gh = gt[:, 3:4]
    gx0 = (gcx - 0.5 * gw) * img_w          # [N, 1]
    gy0 = (gcy - 0.5 * gh) * img_h
    gx1 = (gcx + 0.5 * gw) * img_w
    gy1 = (gcy + 0.5 * gh) * img_h

    # lane-contiguous predicted box rows: [1, M]
    px0 = pbT[0:1, :]
    py0 = pbT[1:2, :]
    px1 = pbT[2:3, :]
    py1 = pbT[3:4, :]

    # --- IoU matrix [N, M] ----------------------------------------------------
    iw = jnp.maximum(jnp.minimum(gx1, px1) - jnp.maximum(gx0, px0), 0.0)
    ih = jnp.maximum(jnp.minimum(gy1, py1) - jnp.maximum(gy0, py0), 0.0)
    inter = iw * ih
    area_g = (gx1 - gx0) * (gy1 - gy0)      # [N, 1]
    area_p = (px1 - px0) * (py1 - py0)      # [1, M]
    # NOTE: no epsilon, matching the torch module's box_iou exactly.
    iou = inter / (area_g + area_p - inter)

    # --- score filter (keep = score > threshold) ------------------------------
    keep = sc > threshold                    # [1, M]
    masked_iou = jnp.where(keep, iou, -1.0)  # [N, M]

    # --- best match per GT box (first-max index, like torch.argmax) -----------
    best_iou = jnp.max(masked_iou, axis=1, keepdims=True)           # [N, 1]
    col = jax.lax.broadcasted_iota(jnp.int32, (N, M), 1)            # [N, M]
    idx_cand = jnp.where(masked_iou == best_iou, col, M)
    best_idx = jnp.min(idx_cand, axis=1, keepdims=True)             # [N, 1]
    valid = best_iou >= threshold                                   # [N, 1]
    onehot = jnp.where((col == best_idx) & valid, 1.0, 0.0)         # [N, M]

    # --- gather matched keypoints (zeros when unmatched) via one MXU dot ------
    kp_matched = jnp.dot(onehot, pk,
                         preferred_element_type=jnp.float32)        # [N, 128]
    kp_ref[...] = kp_matched                                        # lane-dense store

    # --- linear pose embedding: [N, 128] @ [128, D] MXU push ------------------
    emb = jnp.dot(kp_matched, w_ref[...],
                  preferred_element_type=jnp.float32)               # [N, D]
    emb_ref[...] = emb + b_ref[...]


def prepare_linear_params(weight, bias):
    """One-time parameter prep (hoisted out of the forward, per perf review):
    transpose the torch-style [D, 51] weight and zero-pad rows 51 -> 128 so the
    kernel's keypoint path stays lane-dense; padded rows contribute nothing."""
    w_t = jnp.asarray(weight, jnp.float32).T                        # [51, D]
    w_padded = jnp.pad(w_t, ((0, KP_PAD - KP_FEAT), (0, 0)))        # [128, D]
    return w_padded, jnp.asarray(bias, jnp.float32)


def _pose_embedding_forward(gt_boxes_cxcywh, pred_boxes, pred_keypoints,
                            pred_scores, weight_padded, bias, *, img_w, img_h,
                            pose_threshold):
    """Layout glue (fused under jit) + one pallas_call, grid over the batch."""
    B, N, _ = gt_boxes_cxcywh.shape
    M = pred_boxes.shape[1]
    D = weight_padded.shape[1]

    # Lane-major detector outputs so the kernel avoids cross-lane moves.
    pbT = jnp.transpose(pred_boxes, (0, 2, 1))                      # [B, 4, M]
    psT = pred_scores.reshape(B, 1, M)                              # [B, 1, M]

    # Lane-dense keypoint features: pad 51 -> 128 with zeros.
    # TODO(synk): if a real detector emits M >> 8 detections, also pad M up to a
    # multiple of 128 here (with pad scores <= threshold) to keep the IoU slab
    # and its cross-lane reductions on full, unmasked lanes.
    pk_flat = pred_keypoints.reshape(B, M, KP_FEAT)
    pk_pad = jnp.pad(pk_flat, ((0, 0), (0, 0), (0, KP_PAD - KP_FEAT)))

    bias2d = bias.reshape(1, D)

    kernel = functools.partial(pose_embed_kernel, img_w=float(img_w),
                               img_h=float(img_h),
                               threshold=float(pose_threshold))

    emb, kp_pad_out = pl.pallas_call(
        kernel,
        out_shape=(jax.ShapeDtypeStruct((B, N, D), jnp.float32),
                   jax.ShapeDtypeStruct((B, N, KP_PAD), jnp.float32)),
        grid_spec=pl.GridSpec(
            grid=(B,),
            in_specs=[
                pl.BlockSpec((None, N, 4), lambda b: (b, 0, 0)),        # gt boxes
                pl.BlockSpec((None, 4, M), lambda b: (b, 0, 0)),        # pred boxes^T
                pl.BlockSpec((None, M, KP_PAD), lambda b: (b, 0, 0)),   # padded kps
                pl.BlockSpec((None, 1, M), lambda b: (b, 0, 0)),        # scores^T
                pl.BlockSpec((KP_PAD, D), lambda b: (0, 0)),            # padded W^T
                pl.BlockSpec((1, D), lambda b: (0, 0)),                 # bias
            ],
            out_specs=(
                pl.BlockSpec((None, N, D), lambda b: (b, 0, 0)),
                pl.BlockSpec((None, N, KP_PAD), lambda b: (b, 0, 0)),
            ),
        ),
        # Batch axis is embarrassingly parallel: on v7x it shards across both
        # TensorCores; on 1-TC v5e/v6e it only adds ~0.35us per extra step.
        compiler_params=pltpu.CompilerParams(
            dimension_semantics=("parallel",)),
    )(gt_boxes_cxcywh, pbT, pk_pad, psT, weight_padded, bias2d)

    # Return the padded keypoints; consumers slice [..., :KP_FEAT] only if they
    # truly need the 51-wide view (padding columns are exactly zero).
    return emb, kp_pad_out


# jit the whole forward so the wrapper glue fuses with the pallas_call instead
# of dispatching as standalone HLOs (the op is launch/dispatch bound).
pose_embedding_forward = jax.jit(
    _pose_embedding_forward,
    static_argnames=("img_w", "img_h", "pose_threshold"))


def reference_forward(gt_boxes_cxcywh, pred_boxes, pred_keypoints, pred_scores,
                      weight_t, bias, *, img_w, img_h, pose_threshold=0.3):
    """Pure-JAX reference mirroring the torch module semantics."""
    B, N, _ = gt_boxes_cxcywh.shape
    M = pred_boxes.shape[1]
    pk_flat = pred_keypoints.reshape(B, M, KP_FEAT)

    def per_image(gt, pb, pk, sc):
        gx0 = (gt[:, 0] - 0.5 * gt[:, 2]) * img_w
        gy0 = (gt[:, 1] - 0.5 * gt[:, 3]) * img_h
        gx1 = (gt[:, 0] + 0.5 * gt[:, 2]) * img_w
        gy1 = (gt[:, 1] + 0.5 * gt[:, 3]) * img_h
        ixmin = jnp.maximum(gx0[:, None], pb[None, :, 0])
        iymin = jnp.maximum(gy0[:, None], pb[None, :, 1])
        ixmax = jnp.minimum(gx1[:, None], pb[None, :, 2])
        iymax = jnp.minimum(gy1[:, None], pb[None, :, 3])
        inter = jnp.maximum(ixmax - ixmin, 0.) * jnp.maximum(iymax - iymin, 0.)
        ag = ((gx1 - gx0) * (gy1 - gy0))[:, None]
        ap = ((pb[:, 2] - pb[:, 0]) * (pb[:, 3] - pb[:, 1]))[None, :]
        iou = inter / (ag + ap - inter)
        iou = jnp.where(sc[None, :] > pose_threshold, iou, -1.0)
        best_iou = jnp.max(iou, axis=1)
        best_idx = jnp.argmax(iou, axis=1)
        valid = (best_iou >= pose_threshold)[:, None]
        kp_matched = jnp.where(valid, pk[best_idx], 0.0)
        return kp_matched @ weight_t + bias[None, :], kp_matched

    return jax.vmap(per_image)(gt_boxes_cxcywh, pred_boxes, pk_flat, pred_scores)


if __name__ == "__main__":
    # TODO(synk): the pretrained keypointrcnn_resnet50_fpn backbone is not
    # translatable to Pallas; its outputs (pred_boxes / keypoints / scores)
    # are synthesized here instead.
    key = jax.random.PRNGKey(0)
    B, N, M, D = 2, 8, 8, 256
    IMG_H = IMG_W = 64

    k_gt, k_pb, k_kp, k_sc, k_w = jax.random.split(key, 5)

    # GT boxes (cxcywh, normalized)
    gt_cxcy = jax.random.uniform(k_gt, (B, N, 2), minval=0.2, maxval=0.8)
    gt_wh = jax.random.uniform(k_gt, (B, N, 2), minval=0.1, maxval=0.4)
    gt_boxes = jnp.concatenate([gt_cxcy, gt_wh], axis=-1).astype(jnp.float32)

    # Synthetic detector outputs (xyxy absolute boxes, keypoints, scores)
    p0 = jax.random.uniform(k_pb, (B, M, 2), minval=0.0, maxval=0.6 * IMG_W)
    pwh = jax.random.uniform(k_pb, (B, M, 2), minval=4.0, maxval=0.4 * IMG_W)
    pred_boxes = jnp.concatenate([p0, p0 + pwh], axis=-1).astype(jnp.float32)
    pred_keypoints = jax.random.normal(k_kp, (B, M, NUM_JOINTS, 3),
                                       dtype=jnp.float32) * 10.0
    pred_scores = jax.random.uniform(k_sc, (B, M), dtype=jnp.float32)

    # Linear layer params: xavier_uniform weight [D, 51], zero bias (as in __init__)
    limit = math.sqrt(6.0 / (KP_FEAT + D))
    weight = jax.random.uniform(k_w, (D, KP_FEAT), minval=-limit, maxval=limit,
                                dtype=jnp.float32)
    bias = jnp.zeros((D,), dtype=jnp.float32)

    # One-time parameter prep (transpose + pad hoisted out of the forward).
    w_padded, bias_p = prepare_linear_params(weight, bias)

    emb, kp_pad = pose_embedding_forward(gt_boxes, pred_boxes, pred_keypoints,
                                         pred_scores, w_padded, bias_p,
                                         img_w=IMG_W, img_h=IMG_H,
                                         pose_threshold=0.3)
    jax.block_until_ready((emb, kp_pad))

    ref_emb, ref_kp = reference_forward(gt_boxes, pred_boxes, pred_keypoints,
                                        pred_scores, weight.T, bias,
                                        img_w=IMG_W, img_h=IMG_H,
                                        pose_threshold=0.3)
    kp = kp_pad[..., :KP_FEAT]   # consumer-side view for the correctness check
    assert emb.shape == (B, N, D) and kp_pad.shape == (B, N, KP_PAD)
    assert jnp.allclose(kp, ref_kp, atol=1e-3), "keypoint gather mismatch"
    assert jnp.allclose(kp_pad[..., KP_FEAT:], 0.0), "padding not zero"
    assert jnp.allclose(emb, ref_emb, atol=1e-3), "embedding mismatch"

    print("KERNEL_OK")
</pallas_src>

<mosaic_0001>
module attributes {stable_mosaic.version = 11 : i64} {
  func.func @pose_embed_kernel(%arg0: i32, %arg1: memref<1x8x4xf32, #tpu.memory_space<vmem>>, %arg2: memref<1x4x8xf32, #tpu.memory_space<vmem>>, %arg3: memref<1x8x128xf32, #tpu.memory_space<vmem>>, %arg4: memref<1x1x8xf32, #tpu.memory_space<vmem>>, %arg5: memref<128x256xf32, #tpu.memory_space<vmem>>, %arg6: memref<1x256xf32, #tpu.memory_space<vmem>>, %arg7: memref<1x8x256xf32, #tpu.memory_space<vmem>>, %arg8: memref<1x8x128xf32, #tpu.memory_space<vmem>>) attributes {dimension_semantics = [#tpu.dimension_semantics<parallel>], iteration_bounds = array<i64: 2>, scalar_prefetch = 0 : i64, scratch_operands = 0 : i64, tpu.core_type = #tpu.core_type<tc>, window_params = [{transform_indices = @transform_0, window_bounds = array<i64: 1, 8, 4>}, {transform_indices = @transform_1, window_bounds = array<i64: 1, 4, 8>}, {transform_indices = @transform_2, window_bounds = array<i64: 1, 8, 128>}, {transform_indices = @transform_3, window_bounds = array<i64: 1, 1, 8>}, {pipeline_mode = #tpu.pipeline_mode<synchronous>, transform_indices = @transform_4, window_bounds = array<i64: 128, 256>}, {pipeline_mode = #tpu.pipeline_mode<synchronous>, transform_indices = @transform_5, window_bounds = array<i64: 1, 256>}, {transform_indices = @transform_6, window_bounds = array<i64: 1, 8, 256>}, {transform_indices = @transform_7, window_bounds = array<i64: 1, 8, 128>}]} {
    %c0 = arith.constant 0 : index
    %c0_0 = arith.constant 0 : index
    %c0_1 = arith.constant 0 : index
    %0 = vector.load %arg1[%c0, %c0_0, %c0_1] : memref<1x8x4xf32, #tpu.memory_space<vmem>>, vector<1x8x4xf32>
    %1 = vector.shape_cast %0 : vector<1x8x4xf32> to vector<8x4xf32>
    %c0_2 = arith.constant 0 : index
    %c0_3 = arith.constant 0 : index
    %c0_4 = arith.constant 0 : index
    %2 = vector.load %arg2[%c0_2, %c0_3, %c0_4] : memref<1x4x8xf32, #tpu.memory_space<vmem>>, vector<1x4x8xf32>
    %3 = vector.shape_cast %2 : vector<1x4x8xf32> to vector<4x8xf32>
    %c0_5 = arith.constant 0 : index
    %c0_6 = arith.constant 0 : index
    %c0_7 = arith.constant 0 : index
    %4 = vector.load %arg3[%c0_5, %c0_6, %c0_7] : memref<1x8x128xf32, #tpu.memory_space<vmem>>, vector<1x8x128xf32>
    %5 = vector.shape_cast %4 : vector<1x8x128xf32> to vector<8x128xf32>
    %c0_8 = arith.constant 0 : index
    %c0_9 = arith.constant 0 : index
    %c0_10 = arith.constant 0 : index
    %6 = vector.load %arg4[%c0_8, %c0_9, %c0_10] : memref<1x1x8xf32, #tpu.memory_space<vmem>>, vector<1x1x8xf32>
    %7 = vector.shape_cast %6 : vector<1x1x8xf32> to vector<1x8xf32>
    %8 = vector.extract_strided_slice %1 {offsets = [0, 0], sizes = [8, 1], strides = [1, 1]} : vector<8x4xf32> to vector<8x1xf32>
    %9 = vector.extract_strided_slice %1 {offsets = [0, 1], sizes = [8, 1], strides = [1, 1]} : vector<8x4xf32> to vector<8x1xf32>
    %10 = vector.extract_strided_slice %1 {offsets = [0, 2], sizes = [8, 1], strides = [1, 1]} : vector<8x4xf32> to vector<8x1xf32>
    %11 = vector.extract_strided_slice %1 {offsets = [0, 3], sizes = [8, 1], strides = [1, 1]} : vector<8x4xf32> to vector<8x1xf32>
    %cst = arith.constant 5.000000e-01 : f32
    %12 = vector.broadcast %cst : f32 to vector<8x1xf32>
    %13 = arith.mulf %12, %10 : vector<8x1xf32>
    %14 = arith.subf %8, %13 : vector<8x1xf32>
    %cst_11 = arith.constant 6.400000e+01 : f32
    %15 = vector.broadcast %cst_11 : f32 to vector<8x1xf32>
    %16 = arith.mulf %14, %15 : vector<8x1xf32>
    %cst_12 = arith.constant 5.000000e-01 : f32
    %17 = vector.broadcast %cst_12 : f32 to vector<8x1xf32>
    %18 = arith.mulf %17, %11 : vector<8x1xf32>
    %19 = arith.subf %9, %18 : vector<8x1xf32>
    %cst_13 = arith.constant 6.400000e+01 : f32
    %20 = vector.broadcast %cst_13 : f32 to vector<8x1xf32>
    %21 = arith.mulf %19, %20 : vector<8x1xf32>
    %cst_14 = arith.constant 5.000000e-01 : f32
    %22 = vector.broadcast %cst_14 : f32 to vector<8x1xf32>
    %23 = arith.mulf %22, %10 : vector<8x1xf32>
    %24 = arith.addf %8, %23 : vector<8x1xf32>
    %cst_15 = arith.constant 6.400000e+01 : f32
    %25 = vector.broadcast %cst_15 : f32 to vector<8x1xf32>
    %26 = arith.mulf %24, %25 : vector<8x1xf32>
    %cst_16 = arith.constant 5.000000e-01 : f32
    %27 = vector.broadcast %cst_16 : f32 to vector<8x1xf32>
    %28 = arith.mulf %27, %11 : vector<8x1xf32>
    %29 = arith.addf %9, %28 : vector<8x1xf32>
    %cst_17 = arith.constant 6.400000e+01 : f32
    %30 = vector.broadcast %cst_17 : f32 to vector<8x1xf32>
    %31 = arith.mulf %29, %30 : vector<8x1xf32>
    %32 = vector.extract_strided_slice %3 {offsets = [0, 0], sizes = [1, 8], strides = [1, 1]} : vector<4x8xf32> to vector<1x8xf32>
    %33 = vector.extract_strided_slice %3 {offsets = [1, 0], sizes = [1, 8], strides = [1, 1]} : vector<4x8xf32> to vector<1x8xf32>
    %34 = vector.extract_strided_slice %3 {offsets = [2, 0], sizes = [1, 8], strides = [1, 1]} : vector<4x8xf32> to vector<1x8xf32>
    %35 = vector.extract_strided_slice %3 {offsets = [3, 0], sizes = [1, 8], strides = [1, 1]} : vector<4x8xf32> to vector<1x8xf32>
    %36 = vector.broadcast %26 : vector<8x1xf32> to vector<8x8xf32>
    %37 = vector.broadcast %34 : vector<1x8xf32> to vector<8x8xf32>
    %38 = arith.minimumf %36, %37 : vector<8x8xf32>
    %39 = vector.broadcast %16 : vector<8x1xf32> to vector<8x8xf32>
    %40 = vector.broadcast %32 : vector<1x8xf32> to vector<8x8xf32>
    %41 = arith.maximumf %39, %40 : vector<8x8xf32>
    %42 = arith.subf %38, %41 : vector<8x8xf32>
    %cst_18 = arith.constant 0.000000e+00 : f32
    %43 = vector.broadcast %cst_18 : f32 to vector<8x8xf32>
    %44 = arith.maximumf %42, %43 : vector<8x8xf32>
    %45 = vector.broadcast %31 : vector<8x1xf32> to vector<8x8xf32>
    %46 = vector.broadcast %35 : vector<1x8xf32> to vector<8x8xf32>
    %47 = arith.minimumf %45, %46 : vector<8x8xf32>
    %48 = vector.broadcast %21 : vector<8x1xf32> to vector<8x8xf32>
    %49 = vector.broadcast %33 : vector<1x8xf32> to vector<8x8xf32>
    %50 = arith.maximumf %48, %49 : vector<8x8xf32>
    %51 = arith.subf %47, %50 : vector<8x8xf32>
    %cst_19 = arith.constant 0.000000e+00 : f32
    %52 = vector.broadcast %cst_19 : f32 to vector<8x8xf32>
    %53 = arith.maximumf %51, %52 : vector<8x8xf32>
    %54 = arith.mulf %44, %53 : vector<8x8xf32>
    %55 = arith.subf %26, %16 : vector<8x1xf32>
    %56 = arith.subf %31, %21 : vector<8x1xf32>
    %57 = arith.mulf %55, %56 : vector<8x1xf32>
    %58 = arith.subf %34, %32 : vector<1x8xf32>
    %59 = arith.subf %35, %33 : vector<1x8xf32>
    %60 = arith.mulf %58, %59 : vector<1x8xf32>
    %61 = vector.broadcast %57 : vector<8x1xf32> to vector<8x8xf32>
    %62 = vector.broadcast %60 : vector<1x8xf32> to vector<8x8xf32>
    %63 = arith.addf %61, %62 : vector<8x8xf32>
    %64 = arith.subf %63, %54 : vector<8x8xf32>
    %65 = arith.divf %54, %64 : vector<8x8xf32>
    %cst_20 = arith.constant 3.000000e-01 : f32
    %66 = vector.broadcast %cst_20 : f32 to vector<1x8xf32>
    %67 = arith.cmpf ogt, %7, %66 : vector<1x8xf32>
    %cst_21 = arith.constant -1.000000e+00 : f32
    %68 = vector.shape_cast %67 : vector<1x8xi1> to vector<1x8xi1>
    %69 = vector.broadcast %68 : vector<1x8xi1> to vector<8x8xi1>
    %70 = vector.broadcast %cst_21 : f32 to vector<8x8xf32>
    %71 = arith.select %69, %65, %70 : vector<8x8xi1>, vector<8x8xf32>
    %cst_22 = arith.constant dense<0xFF800000> : vector<8xf32>
    %72 = vector.multi_reduction <maximumf>, %71, %cst_22 [1] : vector<8x8xf32> to vector<8xf32>
    %73 = vector.shape_cast %72 : vector<8xf32> to vector<8x1xf32>
    %74 = tpu.iota {dimensions = array<i32: 1>} : vector<8x8xi32>
    %75 = vector.broadcast %73 : vector<8x1xf32> to vector<8x8xf32>
    %76 = arith.cmpf oeq, %71, %75 : vector<8x8xf32>
    %c8_i32 = arith.constant 8 : i32
    %77 = vector.broadcast %c8_i32 : i32 to vector<8x8xi32>
    %78 = arith.select %76, %74, %77 : vector<8x8xi1>, vector<8x8xi32>
    %cst_23 = arith.constant dense<2147483647> : vector<8xi32>
    %79 = vector.multi_reduction <minsi>, %78, %cst_23 [1] : vector<8x8xi32> to vector<8xi32>
    %80 = vector.shape_cast %79 : vector<8xi32> to vector<8x1xi32>
    %cst_24 = arith.constant 3.000000e-01 : f32
    %81 = vector.broadcast %cst_24 : f32 to vector<8x1xf32>
    %82 = arith.cmpf oge, %73, %81 : vector<8x1xf32>
    %83 = vector.broadcast %80 : vector<8x1xi32> to vector<8x8xi32>
    %84 = arith.cmpi eq, %74, %83 : vector<8x8xi32>
    %85 = vector.broadcast %82 : vector<8x1xi1> to vector<8x8xi1>
    %86 = arith.andi %84, %85 : vector<8x8xi1>
    %cst_25 = arith.constant 1.000000e+00 : f32
    %cst_26 = arith.constant 0.000000e+00 : f32
    %87 = vector.broadcast %cst_25 : f32 to vector<8x8xf32>
    %88 = vector.broadcast %cst_26 : f32 to vector<8x8xf32>
    %89 = arith.select %86, %87, %88 : vector<8x8xi1>, vector<8x8xf32>
    %cst_27 = arith.constant dense<0.000000e+00> : vector<8x128xf32>
    %90 = tpu.matmul %89, %5, %cst_27 {dimension_numbers = #tpu.dot_dimension_numbers<[1], [0], [0], [1], [0, 0, 1, 1], [], []>} : vector<8x8xf32>, vector<8x128xf32>, vector<8x128xf32> -> vector<8x128xf32>
    %c0_28 = arith.constant 0 : index
    %c0_29 = arith.constant 0 : index
    %c0_30 = arith.constant 0 : index
    %91 = vector.load %arg8[%c0_28, %c0_29, %c0_30] : memref<1x8x128xf32, #tpu.memory_space<vmem>>, vector<1x8x128xf32>
    %92 = vector.shape_cast %91 : vector<1x8x128xf32> to vector<8x128xf32>
    %93 = vector.shape_cast %90 : vector<8x128xf32> to vector<1x8x128xf32>
    tpu.vector_store %arg8[%c0_28, %c0_29, %c0_30], %93 {strides = array<i32>} : memref<1x8x128xf32, #tpu.memory_space<vmem>>, vector<1x8x128xf32>,
    %c0_31 = arith.constant 0 : index
    %c0_32 = arith.constant 0 : index
    %94 = vector.load %arg5[%c0_31, %c0_32] : memref<128x256xf32, #tpu.memory_space<vmem>>, vector<128x256xf32>
    %cst_33 = arith.constant dense<0.000000e+00> : vector<8x256xf32>
    %95 = tpu.matmul %90, %94, %cst_33 {dimension_numbers = #tpu.dot_dimension_numbers<[1], [0], [0], [1], [0, 0, 1, 1], [], []>} : vector<8x128xf32>, vector<128x256xf32>, vector<8x256xf32> -> vector<8x256xf32>
    %c0_34 = arith.constant 0 : index
    %c0_35 = arith.constant 0 : index
    %96 = vector.load %arg6[%c0_34, %c0_35] : memref<1x256xf32, #tpu.memory_space<vmem>>, vector<1x256xf32>
    %97 = vector.broadcast %96 : vector<1x256xf32> to vector<8x256xf32>
    %98 = arith.addf %95, %97 : vector<8x256xf32>
    %c0_36 = arith.constant 0 : index
    %c0_37 = arith.constant 0 : index
    %c0_38 = arith.constant 0 : index
    %99 = vector.load %arg7[%c0_36, %c0_37, %c0_38] : memref<1x8x256xf32, #tpu.memory_space<vmem>>, vector<1x8x256xf32>
    %100 = vector.shape_cast %99 : vector<1x8x256xf32> to vector<8x256xf32>
    %101 = vector.shape_cast %98 : vector<8x256xf32> to vector<1x8x256xf32>
    tpu.vector_store %arg7[%c0_36, %c0_37, %c0_38], %101 {strides = array<i32>} : memref<1x8x256xf32, #tpu.memory_space<vmem>>, vector<1x8x256xf32>,
    return
  }
  func.func @transform_0(%arg0: i32) -> (i32, i32, i32) {
    %c0_i32 = arith.constant 0 : i32
    %c0_i32_0 = arith.constant 0 : i32
    %c0_i32_1 = arith.constant 0 : i32
    return %arg0, %c0_i32, %c0_i32_0 : i32, i32, i32
  }
  func.func @transform_1(%arg0: i32) -> (i32, i32, i32) {
    %c0_i32 = arith.constant 0 : i32
    %c0_i32_0 = arith.constant 0 : i32
    %c0_i32_1 = arith.constant 0 : i32
    return %arg0, %c0_i32, %c0_i32_0 : i32, i32, i32
  }
  func.func @transform_2(%arg0: i32) -> (i32, i32, i32) {
    %c0_i32 = arith.constant 0 : i32
    %c0_i32_0 = arith.constant 0 : i32
    %c0_i32_1 = arith.constant 0 : i32
    return %arg0, %c0_i32, %c0_i32_0 : i32, i32, i32
  }
  func.func @transform_3(%arg0: i32) -> (i32, i32, i32) {
    %c0_i32 = arith.constant 0 : i32
    %c0_i32_0 = arith.constant 0 : i32
    %c0_i32_1 = arith.constant 0 : i32
    return %arg0, %c0_i32, %c0_i32_0 : i32, i32, i32
  }
  func.func @transform_4(%arg0: i32) -> (i32, i32) {
    %c0_i32 = arith.constant 0 : i32
    %c0_i32_0 = arith.constant 0 : i32
    %c0_i32_1 = arith.constant 0 : i32
    return %c0_i32, %c0_i32_0 : i32, i32
  }
  func.func @transform_5(%arg0: i32) -> (i32, i32) {
    %c0_i32 = arith.constant 0 : i32
    %c0_i32_0 = arith.constant 0 : i32
    %c0_i32_1 = arith.constant 0 : i32
    return %c0_i32, %c0_i32_0 : i32, i32
  }
  func.func @transform_6(%arg0: i32) -> (i32, i32, i32) {
    %c0_i32 = arith.constant 0 : i32
    %c0_i32_0 = arith.constant 0 : i32
    %c0_i32_1 = arith.constant 0 : i32
    return %arg0, %c0_i32, %c0_i32_0 : i32, i32, i32
  }
  func.func @transform_7(%arg0: i32) -> (i32, i32, i32) {
    %c0_i32 = arith.constant 0 : i32
    %c0_i32_0 = arith.constant 0 : i32
    %c0_i32_1 = arith.constant 0 : i32
    return %arg0, %c0_i32, %c0_i32_0 : i32, i32, i32
  }
}

</mosaic_0001>

<bundles_post_ra>
// kernel: _pose_embedding_forward.1
= control target key start
LH: loop header
LB: loop body
LE: loop exit
PB: predicated region body
PF: predicated region fallthrough
CT: control target
= control target key end

     0   :  { %13 = vsyncpa [#allocation3], 0  ;;  %s1343_s0 = inlined_call_operand.vmem [shape: f32[2,8,4], index: 0, kind: input, shape index: {}]   ;;  %s1344_s1 = inlined_call_operand.vmem [shape: f32[2,4,8], index: 1, kind: input, shape index: {}]   ;;  %s1345_s2 = inlined_call_operand.vmem [shape: f32[2,8,128], index: 2, kind: input, shape index: {}]   ;;  %s1346_s3 = inlined_call_operand.vmem [shape: f32[2,1,8], index: 3, kind: input, shape index: {}]   ;;  %s1347_s4 = inlined_call_operand.vmem [shape: f32[128,256], index: 4, kind: input, shape index: {}]   ;;  %s1348_s5 = inlined_call_operand.vmem [shape: f32[1,256], index: 5, kind: input, shape index: {}]   ;;  %s1349_s6 = inlined_call_operand.hbm [shape: f32[2,8,256], index: 6, kind: output, shape index: {0}]   ;;  %s1350_s7 = inlined_call_operand.hbm [shape: f32[2,8,128], index: 7, kind: output, shape index: {1}]  }
   0x1   :  { %15 = vsyncpa [#allocation3 + $0x1], 0 }
   0x2   :  { %16 = vsyncpa [#allocation5], 0 }
   0x3   :  { %18 = vsyncpa [#allocation5 + $0x1], 0  ;;  %s1059_s24 = smov 0   ;;  %s1061_s25 = smov 0  }
   0x4   :  { %s1063_s26 = smov 0   ;;  %s1065_s27 = smov 0  }
   0x5 LB: > { %s1080_s28 = sadd.s32 4294967295, %s1009_s27   ;;  %s801_s29 = sadd.s32 4294967294, %s1009_s27   ;;  %s1009_s27 = sphi %s1065_s27, %s1356_s27   ;;  %s1005_s26 = sphi %s1063_s26, %s1355_s26   ;;  %s1001_s25 = sphi %s1061_s25, %s1354_s25   ;;  %s997_s24 = sphi %s1059_s24, %s1353_s24  }
   0x6   : > { %s1084_s30 = sadd.s32 1, %s1009_s27   ;;  %s177_s8 = sadd.s32 1, %s1005_s26 }
   0x7   : > { %s174_s9 = ssub.s32 %s1009_s27, %s1084_s30  ;;  %p187_p0 = scmp.ne.s32.totalorder %s1005_s26, %s1001_s25 }
   0x8   : > { %p175_p1 = scmp.eq.s32.totalorder %s174_s9, 0  ;;  %p188_p2 = scmp.eq.s32.totalorder %s1080_s28, 1 }
   0x9   : > { %p193_p3 = scmp.ne.s32.totalorder %s1001_s25, %s997_s24  ;;  %p194_p4 = scmp.eq.s32.totalorder %s801_s29, 1 }
   0xa   : > { %s1095_s10 = scalar_select %p175_p1, %s1005_s26, %s177_s8  }
   0xb   : > { %p1097_p5 = por %p188_p2, %p187_p0  ;;  %p1101_p6 = por %p194_p4, %p193_p3 }
   0xc   : > { %p804_p7 = scmp.ge.s32.totalorder %s1009_s27, 1  ;;  %p271_p8 = scmp.lt.s32.totalorder %s1009_s27, 3 }
   0xe   : > { %p272_p9 = pnand %p804_p7, %p271_p8 }
   0xf   : > { %p318_p10 = scmp.lt.s32.totalorder (!%p272_p9), %s1080_s28, 1  ;;  %v1011_v0 = vmov (!%p272_p9), 0   ;;  %v1012_v1 = vmov (!%p272_p9), 1   ;;  %s1013_s18 = smov (!%p272_p9), 126   ;;  %v351_v13 = vlaneseq (!%p272_p9)  ;;  %vm424_vm2 = vcmask (!%p272_p9), 64512   ;;  %v528_v63 = vld [vmem:[%s1347_s4 + $0x8] sm:$0xff] (!%p272_p9) }
  0x10   : > { %275 = sbr.rel (%p272_p9) target bundleno = 1298 (0x512), region = 44  ;;  %908 = vset.pattern.permute.xlu1 (!%p272_p9), %v1011_v0  ;;  %909 = vset.pattern.permute.xlu0 (!%p272_p9), %v1012_v1  ;;  %s1014_s19 = smov (!%p272_p9), 127   ;;  %v1015_v61 = vmov (!%p272_p9), 0.0   ;;  %vm1016_vm5 = vmmov (!%p272_p9), 0  }
  0x11   : > { %v1124_v14 = vshrl.u32 (!%p272_p9), %v351_v13, 7  ;;  %v1142_v51 = vand.u32 (!%p272_p9), 127, %v351_v13  ;;  %821 = vmatprep.subr.mxu0 (!%p272_p9), %v1015_v61  ;;  %823 = vmatprep.mubr.msk.f32.mxu0 (!%p272_p9), %vm1016_vm5, %v1015_v61  ;;  %s1262_s29 = sand.u32 (!%p272_p9), 1, %s1001_s25   ;;  %s815_s15 = sshll.u32 (!%p272_p9), %s1080_s28, 7 }
  0x12   : > { %635 = vmatprep.mubr.f32.mxu1 (!%p272_p9), %v1015_v61  ;;  %s806_s8 = sshll.u32 (!%p272_p9), %s1262_s29, 3  ;;  %s1017_s21 = smov (!%p272_p9), [#allocation4]  }
  0x13   : > { %v383_v17 = vsub.s32 (!%p272_p9), 1, %v1124_v14  ;;  %v1128_v19 = vsub.s32 (!%p272_p9), 0, %v1124_v14  ;;  %v374_v20 = vsub.s32 (!%p272_p9), 3, %v1124_v14  ;;  %v353_v21 = vsub.s32 (!%p272_p9), 2, %v1124_v14 }
  0x17   : > { %s1110_s13 = scalar_select %p318_p10, %s1080_s28, 1 }
  0x19   : > { %s807_s14 = sshll.u32 %s1110_s13, 3  ;;  %s808_s20 = sshll.u32 %s1110_s13, 2 }
  0x1a   : > { %s321_s17 = scalar_lea.vmem %s1343_s0, %s807_s14  ;;  %s325_s23 = scalar_lea.vmem %s1344_s1, %s808_s20 }
  0x1b   : > { %v333_v2 = vld [vmem:[%s321_s17] sm:$0xff]  ;;  %s332_s9 = scalar_lea.vmem %s1346_s3, %s1110_s13  ;;  %s329_s17 = scalar_lea.vmem %s1345_s2, %s807_s14 }
  0x1c   : > { %v337_v3 = vmul.f32 0.5, %v333_v2  ;;  %v334_v15 = vld [vmem:[%s325_s23] sm:$0xf]  ;;  %s650_s20 = scalar_lea.sflag [#allocation5], %s1262_s29  ;;  %s919_s14 = sshll.u32 %s1017_s21, 4  ;;  %s920_s14 = int_to_ptr.vmem [resolvable:$false] %s919_s14 }
  0x1d   : > { %v396_v18 = vrot.slane %v334_v15, 6  ;;  %v384_v22 = vrot.slane %v334_v15, %v383_v17  ;;  %v364_v25 = vrot.slane %v334_v15, %v1128_v19  ;;  %v375_v26 = vrot.slane %v334_v15, %v374_v20  ;;  %v336_v43 = vld [vmem:[%s332_s9] sm:$0x1]  ;;  %v542_v20 = vld [vmem:[%s1347_s4 + $0x78] sm:$0xff]  ;;  %s317_s9 = scalar_lea.vmem [#allocation4], %s806_s8  ;;  %s921_s22 = scalar_lea.vmem %s920_s14, 256 }
  0x1e   : > { %339 = vrot.lane.b32.xlu0 %v337_v3, %s1013_s18  ;;  %v354_v28 = vrot.slane %v334_v15, %v353_v21  ;;  %vm416_vm0 = vcmp.gt.f32.partialorder %v336_v43, 0.3  ;;  %v335_v62 = vld [vmem:[%s329_s17] sm:$0xff]  ;;  %v529_v3 = vld [vmem:[%s1347_s4 + $0x10] sm:$0xff]  ;;  %v556_v43 = vld [vmem:[%s1347_s4 + $0xe8] sm:$0xff]  ;;  %s677_s16 = sshll.u32 %s317_s9, 4  ;;  %s678_s16 = int_to_ptr.vmem [resolvable:$true] %s677_s16 }
  0x1f   : > { %v398_v23 = vsub.f32 %v334_v15, %v396_v18  ;;  %v417_v45 = vsel %vm416_vm0, 1, %v1011_v0  ;;  %822 = vmatpush3.msra.mxu0 %v335_v62  ;;  %v535_v15 = vld [vmem:[%s1347_s4 + $0x40] sm:$0xff]  ;;  %v540_v18 = vld [vmem:[%s1347_s4 + $0x68] sm:$0xff]  ;;  %s915_s13 = scalar_lea.vmem %s678_s16, 128  ;;  %p922_p0 = scmp.lt.s32.totalorder %s678_s16, %s920_s14 }
  0x20   : > { %v421_v46 = vrot.slane %v417_v45, %v1128_v19  ;;  %p916_p11 = scmp.ne.s32.totalorder %s678_s16, %s915_s13  ;;  %p923_p1 = scmp.lt.s32.totalorder %s921_s22, %s915_s13 }
  0x21   : > { %v400_v30 = vrot.slane %v398_v23, 1 }
  0x22   : > { %vm422_vm1 = vcmp.eq.s32.totalorder %v421_v46, 1  ;;  %p917_p12 = pnand %p916_p11, %p1097_p5  ;;  %p924_p2 = por %p923_p1, %p922_p0 }
  0x23   : > { %v402_v35 = vmul.f32 %v400_v30, %v398_v23  ;;  %v539_v23 = vld [vmem:[%s1347_s4 + $0x60] sm:$0xff]  ;;  %v545_v30 = vld [vmem:[%s1347_s4 + $0x90] sm:$0xff] }
  0x24   : > { %p918_p13 = pneg %p917_p12 }
  0x25   : > { %v411_v38 = vrot.slane %v402_v35, %v353_v21  ;;  %v547_v35 = vld [vmem:[%s1347_s4 + $0xa0] sm:$0xff] }
  0x26   : > { %p925_p3 = pnand %p924_p2, %p918_p13 }
  0x90   : > { %v340_v4 = vpop.permute.xlu0 %339 }
  0x91   : > { %v342_v5 = vsub.f32 %v333_v2, %v340_v4  ;;  %v344_v6 = vadd.f32 %v340_v4, %v333_v2  ;;  %v532_v4 = vld [vmem:[%s1347_s4 + $0x28] sm:$0xff] }
  0x93   : > { %v343_v7 = vmul.f32 64.0, %v342_v5  ;;  %v345_v8 = vmul.f32 64.0, %v344_v6  ;;  %v534_v5 = vld [vmem:[%s1347_s4 + $0x38] sm:$0xff] }
  0x95   : > { %348 = vperm.xlu1 %908, %v345_v8   ;;  %v389_v9 = vsub.f32 %v345_v8, %v343_v7 }
  0x97   : > { %391 = vrot.lane.b32.xlu0 %v389_v9, %s1014_s19  ;;  %s1269_s19 = scalar_lea.hbm %s1350_s7, %s815_s15 }
  0x99   : > { %358 = vperm.xlu1 %908, %v343_v7  }
  0x9b   : > { %369 = vperm.xlu0 %909, %v345_v8   ;;  %v531_v8 = vld [vmem:[%s1347_s4 + $0x20] sm:$0xff] }
  0x9d   : > { %910 = vset.pattern.permute.xlu1 %v1012_v1  ;;  %v527_v1 = vld [vmem:[%s1347_s4] sm:$0xff] }
  0x9e   : > { %378 = vperm.xlu1 %910, %v343_v7   ;;  %v828_v6 = vpack.c.bf16 %v529_v3, %v527_v1  ;;  %v830_v7 = vpack.c.bf16 %v534_v5, %v532_v4 }
  0x9f   : > { %912 = vset.pattern.permute.xlu0 %v1011_v0 }
  0xa2   : > { %911 = vset.pattern.permute.xlu1 %v1011_v0  ;;  %v530_v0 = vld [vmem:[%s1347_s4 + $0x18] sm:$0xff] }
  0xa3   : > { %v826_v2 = vpack.c.bf16 %v530_v0, %v528_v63 }
  0xa5   : > { %827 = vmatprep.subr.bf16.mxu1 %v826_v2 }
  0xa6   : > { %829 = vmatpush1.bf16.msra.mxu1 %v828_v6 }
  0xa7   : > { %831 = vmatprep.subr.bf16.mxu1 %v830_v7 }
 0x109   : > { %v392_v10 = vpop.permute.xlu0 %391 }
 0x10a   : > { %v394_v11 = vmul.f32 %v392_v10, %v389_v9  ;;  %v533_v9 = vld [vmem:[%s1347_s4 + $0x30] sm:$0xff]  ;;  %v536_v10 = vld [vmem:[%s1347_s4 + $0x48] sm:$0xff] }
 0x10c   : > { %405 = vperm.xlu1 %911, %v394_v11   ;;  %v538_v11 = vld [vmem:[%s1347_s4 + $0x58] sm:$0xff] }
 0x10d   : > { %v834_v13 = vpack.c.bf16 %v538_v11, %v536_v10 }
 0x114   : > { %v349_v12 = vpop.permute.xlu1 %348 }
 0x115   : > { %v355_v33 = vmin.f32 %v349_v12, %v354_v28  ;;  %v832_v12 = vpack.c.bf16 %v533_v9, %v531_v8 }
 0x117   : > { %833 = vmatpush1.bf16.msra.mxu1 %v832_v12 }
 0x118   : > { %v359_v16 = vpop.permute.xlu1 %358  ;;  %835 = vmatprep.subr.bf16.mxu1 %v834_v13 }
 0x119   : > { %v365_v31 = vmax.f32 %v359_v16, %v364_v25  ;;  %v537_v16 = vld [vmem:[%s1347_s4 + $0x50] sm:$0xff]  ;;  %v544_v25 = vld [vmem:[%s1347_s4 + $0x88] sm:$0xff] }
 0x11a   : > { %v370_v27 = vpop.permute.xlu0 %369  ;;  %v836_v21 = vpack.c.bf16 %v537_v16, %v535_v15 }
 0x11b   : > { %v376_v32 = vmin.f32 %v370_v27, %v375_v26  ;;  %v366_v36 = vsub.f32 %v355_v33, %v365_v31  ;;  %v546_v26 = vld [vmem:[%s1347_s4 + $0x98] sm:$0xff]  ;;  %v548_v31 = vld [vmem:[%s1347_s4 + $0xa8] sm:$0xff] }
 0x11c   : > { %837 = vmatpush1.bf16.msra.mxu1 %v836_v21  ;;  %v842_v28 = vpack.c.bf16 %v546_v26, %v544_v25 }
 0x11d   : > { %v379_v24 = vpop.permute.xlu1 %378  ;;  %v367_v39 = vmax.f32 %v366_v36, 0.0  ;;  %v549_v36 = vld [vmem:[%s1347_s4 + $0xb0] sm:$0xff] }
 0x11e   : > { %v385_v29 = vmax.f32 %v379_v24, %v384_v22  ;;  %v838_v22 = vpack.c.bf16 %v542_v20, %v540_v18  ;;  %v541_v24 = vld [vmem:[%s1347_s4 + $0x70] sm:$0xff] }
 0x11f   : > { %v840_v27 = vpack.c.bf16 %v541_v24, %v539_v23 }
 0x120   : > { %v386_v34 = vsub.f32 %v376_v32, %v385_v29  ;;  %839 = vmatprep.subr.bf16.mxu1 %v838_v22  ;;  %v543_v29 = vld [vmem:[%s1347_s4 + $0x80] sm:$0xff]  ;;  %v550_v32 = vld [vmem:[%s1347_s4 + $0xb8] sm:$0xff] }
 0x121   : > { %841 = vmatpush1.bf16.msra.mxu1 %v840_v27  ;;  %v844_v33 = vpack.c.bf16 %v545_v30, %v543_v29 }
 0x122   : > { %v387_v37 = vmax.f32 %v386_v34, 0.0  ;;  %843 = vmatprep.subr.bf16.mxu1 %v842_v28  ;;  %v846_v34 = vpack.c.bf16 %v550_v32, %v548_v31 }
 0x124   : > { %v388_v41 = vmul.f32 %v387_v37, %v367_v39  ;;  %v552_v37 = vld [vmem:[%s1347_s4 + $0xc8] sm:$0xff]  ;;  %v848_v39 = vpack.c.bf16 %v549_v36, %v547_v35 }
 0x125   : > { %845 = vmatpush1.bf16.msra.mxu1 %v844_v33 }
 0x126   : > { %847 = vmatprep.subr.bf16.mxu1 %v846_v34 }
 0x129   : > { %849 = vmatpush1.bf16.msra.mxu1 %v848_v39 }
 0x18b   : > { %v406_v40 = vpop.permute.xlu1 %405 }
 0x18c   : > { %v412_v42 = vadd.f32 %v411_v38, %v406_v40  ;;  %v554_v38 = vld [vmem:[%s1347_s4 + $0xd8] sm:$0xff] }
 0x18d   : > { %v850_v40 = vpack.c.bf16 %v554_v38, %v552_v37 }
 0x18e   : > { %v413_v44 = vsub.f32 %v412_v42, %v388_v41  ;;  %v553_v42 = vld [vmem:[%s1347_s4 + $0xd0] sm:$0xff] }
 0x18f   : > { %851 = vmatprep.subr.bf16.mxu1 %v850_v40 }
 0x190   : > { %913 = vrcp.f32 %v413_v44  ;;  %v558_v44 = vld [vmem:[%s1347_s4 + $0xf8] sm:$0xff] }
 0x191   : > { %v854_v46 = vpack.c.bf16 %v558_v44, %v556_v43 }
 0x19a   : > { %v914_v47 = vpop.eup %913 }
 0x19b   : > { %v415_v48 = vmul.f32 %v914_v47, %v388_v41  ;;  %v551_v41 = vld [vmem:[%s1347_s4 + $0xc0] sm:$0xff] }
 0x19c   : > { %v852_v45 = vpack.c.bf16 %v553_v42, %v551_v41  ;;  %v555_v47 = vld [vmem:[%s1347_s4 + $0xe0] sm:$0xff] }
 0x19d   : > { %v423_v49 = vsel %vm422_vm1, %v415_v48, -1.0  ;;  %v557_v48 = vld [vmem:[%s1347_s4 + $0xf0] sm:$0xff] }
 0x19e   : > { %v425_v50 = vsel %vm424_vm2, %v423_v49, -inf  ;;  %853 = vmatpush1.bf16.msra.mxu1 %v852_v45 }
 0x19f   : > { %426 = vmax.xlane.f32.xlu0 %v425_v50  ;;  %855 = vmatprep.subr.bf16.mxu1 %v854_v46 }
 0x22c   : > { %v1144_v52 = vpop.xlane.xlu0 %426 }
 0x22d   : > { %vm430_vm3 = vcmp.eq.f32.partialorder %v423_v49, %v1144_v52  ;;  %v856_v49 = vpack.c.bf16 %v557_v48, %v555_v47  ;;  %vm447_vm6 = vcmp.ge.f32.partialorder %v1144_v52, 0.3 }
 0x22e   : > { %v431_v53 = vsel %vm430_vm3, %v1142_v51, 8 }
 0x22f   : > { %v432_v54 = vsel %vm424_vm2, %v431_v53, 2147483647  ;;  %857 = vmatpush1.bf16.msra.mxu1 %v856_v49 }
 0x230   : > { %v434_v55 = vshra.s32 %v432_v54, 16  ;;  %v433_v57 = vand.u32 65535, %v432_v54 }
 0x232   : > { %v436_v56 = vcvt.s32.f32 %v434_v55  ;;  %v435_v59 = vcvt.s32.f32 %v433_v57 }
 0x234   : > { %437 = vmin.xlane.f32.xlu1 %v436_v56 }
 0x2c1   : > { %v1149_v58 = vpop.xlane.xlu1 %437 }
 0x2c2   : > { %vm439_vm4 = vcmp.eq.f32.partialorder %v436_v56, %v1149_v58  ;;  %v444_v50 = vcvt.f32.s32 %v1149_v58 }
 0x2c3   : > { %v440_v60 = vsel %vm439_vm4, %v435_v59, inf }
 0x2c4   : > { %441 = vmin.xlane.f32.xlu0 %v440_v60  ;;  %v445_v54 = vshll.u32 %v444_v50, 16 }
 0x351   : > { %v442_v53 = vpop.xlane.xlu0 %441 }
 0x352   : > { %v443_v55 = vcvt.f32.s32 %v442_v53 }
 0x354   : > { %v446_v56 = vadd.s32 %v445_v54, %v443_v55 }
 0x356   : > { %vm448_vm7 = vcmp.eq.s32.totalorder %v1142_v51, %v446_v56 }
 0x357   : > { %vm451_vm8 = vmand %vm448_vm7, %vm447_vm6 }
 0x358   : > { %v452_v57 = vsel %vm451_vm8, 1.0, %v1015_v61 }
 0x359   : > { %824 = vmatmul.mubr.msk.f32.vlgmr.msra.gmra.mrb[0].mxu0 %vm424_vm2, %v452_v57 }
 0x42c   : > { %v522_v58 = vpop.f32.mrb[0].mxu0 }
 0x42d   : > { %526 = vst [vmem:[%s317_s9] sm:$0xff] %v522_v58  ;;  %v825_v59 = vpop.f32.mrb[1].mxu0  ;;  %636 = vmatmul.mubr.f32.vlgmr.msra.gmra.mrb[0].mxu1 %v522_v58 }
 0x42e   : > { %928 = shalt.err (!%p925_p3)
}
 0x42f   : > { %s929_s23 = scalar_lea.hbm %s1269_s19, 128  ;;  %s933_s15 = scalar_lea.hbm %s1350_s7, 256 }
 0x430   : > { %p930_p4 = scmp.ne.s32.totalorder %s1269_s19, %s929_s23  ;;  %p934_p9 = scmp.lt.u32.totalorder %s1269_s19, %s1350_s7 }
 0x431   : > { %p935_p10 = scmp.lt.u32.totalorder %s933_s15, %s929_s23  ;;  %p937_p12 = scmp.lt.u32.totalorder %s929_s23, %s1269_s19 }
 0x432   : > { %p931_p7 = pnand %p930_p4, %p1097_p5 }
 0x433   : > { %p936_p11 = por %p935_p10, %p934_p9 }
 0x434   : > { %p932_p8 = pneg %p931_p7 }
 0x435   : > { %p938_p13 = por %p937_p12, %p936_p11 }
 0x437   : > { %p939_p0 = pnand %p938_p13, %p932_p8 }
 0x439   : > { %942 = shalt.err (!%p939_p0)
}
 0x43a   : > { %859 = dma.vmem_to_hbm [thread:$0]  (%p1097_p5), %s678_s16, 128, %s1269_s19, %s650_s20   ;;  %v559_v51 = vld [vmem:[%s1348_s5] sm:$0x3] }
 0x43b   : > { %s805_s13 = sshll.u32 %s1262_s29, 4  ;;  %v564_v52 = vrot.slane %v559_v51, %v1128_v19  ;;  %v568_v60 = vrot.slane %v559_v51, %v383_v17  ;;  %s818_s22 = sshll.u32 %s1080_s28, 8 }
 0x43c   : > { %s310_s23 = scalar_lea.vmem [#allocation2], %s805_s13  ;;  %s1300_s20 = scalar_lea.hbm %s1349_s6, %s818_s22 }
 0x43d   : > { %s664_s8 = sshll.u32 %s310_s23, 4  ;;  %s645_s9 = scalar_lea.sflag [#allocation3], %s1262_s29  ;;  %s1302_s8 = int_to_ptr.vmem [resolvable:$true] %s664_s8 }
 0x43e   : > { %s943_s28 = scalar_lea.vmem %s1302_s8, 256  ;;  %s1018_s15 = smov [#allocation2]  }
 0x43f   : > { %p944_p1 = scmp.ne.s32.totalorder %s1302_s8, %s943_s28  ;;  %s947_s17 = sshll.u32 %s1018_s15, 4  ;;  %s948_s17 = int_to_ptr.vmem [resolvable:$false] %s947_s17 }
 0x440   : > { %s949_s18 = scalar_lea.vmem %s948_s17, 512  ;;  %p950_p4 = scmp.lt.s32.totalorder %s1302_s8, %s948_s17 }
 0x441   : > { %p945_p2 = pnand %p944_p1, %p1097_p5  ;;  %p951_p7 = scmp.lt.s32.totalorder %s949_s18, %s943_s28 }
 0x443   : > { %p946_p3 = pneg %p945_p2  ;;  %p952_p8 = por %p951_p7, %p950_p4 }
 0x445   : > { %p953_p9 = pnand %p952_p8, %p946_p3 }
 0x500   : > { %v637_v61 = vpop.f32.mrb[0].mxu1 }
 0x501   : > { %v638_v62 = vadd.f32 %v637_v61, %v564_v52  ;;  %v639_v63 = vpop.f32.mrb[1].mxu1 }
 0x502   : > { %v640_v0 = vadd.f32 %v639_v63, %v568_v60 }
 0x503   : > { %642 = vst [vmem:[%s310_s23] sm:$0xff] %v638_v62 }
 0x504   : > { %643 = vst [vmem:[%s310_s23 + $0x8] sm:$0xff] %v640_v0 }
 0x505   : > { %956 = shalt.err (!%p953_p9)
}
 0x506   : > { %s957_s29 = scalar_lea.hbm %s1300_s20, 256  ;;  %s961_s14 = scalar_lea.hbm %s1349_s6, 512 }
 0x507   : > { %p958_p10 = scmp.ne.s32.totalorder %s1300_s20, %s957_s29  ;;  %p962_p13 = scmp.lt.u32.totalorder %s1300_s20, %s1349_s6 }
 0x508   : > { %p963_p0 = scmp.lt.u32.totalorder %s961_s14, %s957_s29  ;;  %p965_p2 = scmp.lt.u32.totalorder %s957_s29, %s1300_s20 }
 0x509   : > { %p959_p11 = pnand %p958_p10, %p1097_p5 }
 0x50a   : > { %p964_p1 = por %p963_p0, %p962_p13 }
 0x50b   : > { %p960_p12 = pneg %p959_p11 }
 0x50c   : > { %p966_p3 = por %p965_p2, %p964_p1 }
 0x50e   : > { %p967_p4 = pnand %p966_p3, %p960_p12 }
 0x510   : > { %970 = shalt.err (!%p967_p4)
}
 0x511   : > { %858 = dma.vmem_to_hbm [thread:$0]  (%p1097_p5), %s1302_s8, 256, %s1300_s20, %s645_s9  }
 0x512 PF: > { %p869_p7 = scmp.ge.s32.totalorder %s1009_s27, 2  ;;  %s689_s16 = sand.u32 1, %s997_s24  }
 0x513   : > { %s690_s19 = scalar_lea.sflag [#allocation3], %s689_s16 }
 0x514   : > { %p863_p8 = pnand %p869_p7, %p1101_p6 }
 0x516   : > { %988 = dma.done.wait (!%p863_p8), %s690_s19, 256  }
 0x517   : > { %990 = vsyncadd (!%p863_p8), %s690_s19, 4294967040  ;;  %s699_s28 = scalar_lea.sflag [#allocation5], %s689_s16 }
 0x518   : > { %992 = dma.done.wait (!%p863_p8), %s699_s28, 128  }
 0x519   : > { %994 = vsyncadd (!%p863_p8), %s699_s28, 4294967168  ;;  %p21_p5 = scmp.ge.s32.totalorder %s1084_s30, 4   ;;  %s1353_s24 = smov %s1001_s25 }
 0x51a   : > { %s1354_s25 = smov %s1005_s26  ;;  %s1355_s26 = smov %s1095_s10 }
 0x51b   : > { %s1356_s27 = smov %s1084_s30  ;;  %23 = sbr.rel (!%p21_p5) target bundleno = 5 (0x5), region = 105 }
 0x522   :  { %704 = vsyncpa [#allocation3], 1 }
 0x523   :  { %706 = vsyncpa [#allocation3 + $0x1], 1 }
 0x524   :  { %707 = vsyncpa [#allocation5], 1 }
 0x525   :  { %709 = vsyncpa [#allocation5 + $0x1], 1 }

</bundles_post_ra>
